<compile_context>
chip_gen: v7x
topology: tpu7x:2x2x1
jax: 0.10.0
libtpu: 0.0.40
codegen_flags: <defaults>
</compile_context>

<pallas_src>
import math

import jax
import jax.numpy as jnp
from jax.experimental import pallas as pl
from jax.experimental.pallas import tpu as pltpu

LANES = 128
SUBLANES = 8
TARGET_BLOCK_BYTES = 4 * 1024 * 1024  # ~4 MiB of input I/O per block


def _softplus_kernel(scal_ref, x_ref, o_ref):
    # SMEM scalars: [beta_eff, 1/beta_eff, log(2)/beta_eff, threshold]
    beta = scal_ref[0]
    inv_beta = scal_ref[1]
    off_scaled = scal_ref[2]
    thr = scal_ref[3]

    x = x_ref[...].astype(jnp.float32)
    bx = beta * x
    # torch.nn.functional.softplus(bx, beta=1.0, threshold=thr):
    #   bx > thr  -> bx (linear region), else log1p(exp(bx)).
    # Clamp the exp argument so the discarded branch never overflows.
    safe = jnp.minimum(bx, thr)
    sp = jnp.where(bx > thr, bx, jnp.log1p(jnp.exp(safe)))
    # (sp - offset) / beta  ==  sp * (1/beta) - offset * (1/beta)
    o_ref[...] = (sp * inv_beta - off_scaled).astype(o_ref.dtype)


def _round_up(x: int, m: int) -> int:
    return ((x + m - 1) // m) * m


def _cdiv(a: int, b: int) -> int:
    return -(-a // b)


def _pick_tile_rows(rows: int, itemsize: int, block_bytes: int) -> int:
    """Byte-targeted block rows; multiple of 8 whenever the block tiles the array."""
    target_rows = max(
        SUBLANES, (block_bytes // (LANES * itemsize)) // SUBLANES * SUBLANES
    )
    if rows <= target_rows:
        # Single full-extent block (always a legal block dim).
        return rows
    tile_r = target_rows
    n_tiles = _cdiv(rows, tile_r)
    # Bias toward an even grid length for v7x's two TensorCores.
    if n_tiles > 1 and n_tiles % 2 == 1:
        alt = _round_up(_cdiv(rows, n_tiles + 1), SUBLANES)
        if alt >= SUBLANES and _cdiv(rows, alt) % 2 == 0:
            tile_r = alt
    return tile_r


def parametric_softplus(
    x: jax.Array,
    log_beta: jax.Array,
    *,
    threshold: float = 20.0,
    eps: float = 1e-3,
    block_bytes: int = TARGET_BLOCK_BYTES,
) -> jax.Array:
    """Pallas TPU implementation of ParametricSoftplus.forward."""
    orig_shape = x.shape
    orig_dtype = x.dtype

    # Scalar prep in plain JAX (cheap); shipped to SMEM as f32[4].
    beta_eff = jnp.exp(log_beta.astype(jnp.float32)) + jnp.float32(eps)
    inv_beta = jnp.float32(1.0) / beta_eff
    scalars = jnp.stack(
        [
            beta_eff,
            inv_beta,
            jnp.float32(math.log(2.0)) * inv_beta,
            jnp.float32(threshold),
        ]
    )

    # Flatten to a lane-dense (rows, 128) slab.  Row raggedness is handled by a
    # cdiv grid inside the kernel (no pad); only a sub-lane remainder pays a
    # pad/unpad copy.
    # TODO(synk): handle n % 128 != 0 without the pad pass via a 1-D manual-DMA
    # tail path (rare for NCHW activations).
    xf = x.reshape(-1)
    n = xf.shape[0]
    pad = (-n) % LANES
    if pad:
        xf = jnp.pad(xf, (0, pad))
    rows = (n + pad) // LANES
    x2d = xf.reshape(rows, LANES)

    itemsize = jnp.dtype(orig_dtype).itemsize
    tile_r = _pick_tile_rows(rows, itemsize, block_bytes)
    grid = (_cdiv(rows, tile_r),)

    out2d = pl.pallas_call(
        _softplus_kernel,
        out_shape=jax.ShapeDtypeStruct((rows, LANES), orig_dtype),
        grid=grid,
        in_specs=[
            pl.BlockSpec(memory_space=pltpu.MemorySpace.SMEM),  # scalars
            pl.BlockSpec((tile_r, LANES), lambda i: (i, 0)),
        ],
        out_specs=pl.BlockSpec((tile_r, LANES), lambda i: (i, 0)),
        compiler_params=pltpu.CompilerParams(
            dimension_semantics=("parallel",),
            vmem_limit_bytes=32 * 1024 * 1024,
        ),
    )(scalars, x2d)

    if pad:
        return out2d.reshape(-1)[:n].reshape(orig_shape)
    return out2d.reshape(orig_shape)


def _reference(x, log_beta, threshold=20.0, eps=1e-3):
    """Pure-JAX reference of the module semantics (f32 internal)."""
    xf = x.astype(jnp.float32)
    beta_eff = jnp.exp(log_beta.astype(jnp.float32)) + jnp.float32(eps)
    bx = beta_eff * xf
    sp = jnp.where(bx > threshold, bx, jnp.log1p(jnp.exp(jnp.minimum(bx, threshold))))
    return ((sp - jnp.float32(math.log(2.0))) / beta_eff).astype(x.dtype)


if __name__ == "__main__":
    key = jax.random.PRNGKey(0)

    # Deterministic parameter init matching the module: log_beta = log(5.0)
    log_beta = jnp.log(jnp.asarray(5.0, dtype=jnp.float32))

    # 1) Small NCHW f32 input (module's typical use).
    x = jax.random.normal(key, (2, 4, 16, 16), dtype=jnp.float32) * 3.0
    y = parametric_softplus(x, log_beta, threshold=20.0, eps=1e-3)
    jax.block_until_ready(y)
    y_ref = _reference(x, log_beta)
    assert jnp.allclose(y, y_ref, atol=1e-5, rtol=1e-5)

    # 2) bf16 input.
    x_bf = (jax.random.normal(jax.random.PRNGKey(1), (4, 8, 32, 32)) * 3.0).astype(
        jnp.bfloat16
    )
    y_bf = parametric_softplus(x_bf, log_beta)
    jax.block_until_ready(y_bf)
    assert jnp.allclose(
        y_bf.astype(jnp.float32),
        _reference(x_bf, log_beta).astype(jnp.float32),
        atol=2e-2,
        rtol=2e-2,
    )

    # 3) Row count not a multiple of the tile -> exercises the cdiv ragged-last-
    #    block path (small block_bytes forces multiple grid steps at small size).
    x_rag = jax.random.normal(jax.random.PRNGKey(2), (5, 8, 128), dtype=jnp.float32) * 3.0
    y_rag = parametric_softplus(x_rag, log_beta, block_bytes=8 * 1024)
    jax.block_until_ready(y_rag)
    assert jnp.allclose(y_rag, _reference(x_rag, log_beta), atol=1e-5, rtol=1e-5)

    # 4) Element count not a multiple of 128 -> pad/unpad fallback path.
    x_odd = jax.random.normal(jax.random.PRNGKey(3), (3, 5, 7, 11), dtype=jnp.float32) * 3.0
    y_odd = parametric_softplus(x_odd, log_beta)
    jax.block_until_ready(y_odd)
    assert jnp.allclose(y_odd, _reference(x_odd, log_beta), atol=1e-5, rtol=1e-5)

    print("KERNEL_OK")
</pallas_src>

<mosaic_0001>
module attributes {stable_mosaic.version = 11 : i64} {
  func.func @_softplus_kernel(%arg0: i32, %arg1: memref<4xf32, #tpu.memory_space<smem>>, %arg2: memref<16x128xf32, #tpu.memory_space<vmem>>, %arg3: memref<16x128xf32, #tpu.memory_space<vmem>>) attributes {dimension_semantics = [#tpu.dimension_semantics<parallel>], iteration_bounds = array<i64: 1>, scalar_prefetch = 0 : i64, scratch_operands = 0 : i64, tpu.core_type = #tpu.core_type<tc>, window_params = [{transform_indices = @transform_0, window_bounds = array<i64: 4>}, {transform_indices = @transform_1, window_bounds = array<i64: 16, 128>}, {transform_indices = @transform_2, window_bounds = array<i64: 16, 128>}]} {
    %c0 = arith.constant 0 : index
    %0 = memref.load %arg1[%c0] : memref<4xf32, #tpu.memory_space<smem>>
    %c1 = arith.constant 1 : index
    %1 = memref.load %arg1[%c1] : memref<4xf32, #tpu.memory_space<smem>>
    %c2 = arith.constant 2 : index
    %2 = memref.load %arg1[%c2] : memref<4xf32, #tpu.memory_space<smem>>
    %c3 = arith.constant 3 : index
    %3 = memref.load %arg1[%c3] : memref<4xf32, #tpu.memory_space<smem>>
    %c0_0 = arith.constant 0 : index
    %c0_1 = arith.constant 0 : index
    %4 = vector.load %arg2[%c0_0, %c0_1] : memref<16x128xf32, #tpu.memory_space<vmem>>, vector<16x128xf32>
    %5 = vector.broadcast %0 : f32 to vector<16x128xf32>
    %6 = arith.mulf %5, %4 : vector<16x128xf32>
    %7 = vector.broadcast %3 : f32 to vector<16x128xf32>
    %8 = arith.minimumf %6, %7 : vector<16x128xf32>
    %9 = vector.broadcast %3 : f32 to vector<16x128xf32>
    %10 = arith.cmpf ogt, %6, %9 : vector<16x128xf32>
    %11 = math.exp %8 : vector<16x128xf32>
    %12 = math.log1p %11 : vector<16x128xf32>
    %13 = arith.select %10, %6, %12 : vector<16x128xi1>, vector<16x128xf32>
    %14 = vector.broadcast %1 : f32 to vector<16x128xf32>
    %15 = arith.mulf %13, %14 : vector<16x128xf32>
    %16 = vector.broadcast %2 : f32 to vector<16x128xf32>
    %17 = arith.subf %15, %16 : vector<16x128xf32>
    %c0_2 = arith.constant 0 : index
    %c0_3 = arith.constant 0 : index
    %18 = vector.load %arg3[%c0_2, %c0_3] : memref<16x128xf32, #tpu.memory_space<vmem>>, vector<16x128xf32>
    tpu.vector_store %arg3[%c0_2, %c0_3], %17 {strides = array<i32>} : memref<16x128xf32, #tpu.memory_space<vmem>>, vector<16x128xf32>,
    return
  }
  func.func @transform_0(%arg0: i32) -> i32 {
    %c0_i32 = arith.constant 0 : i32
    %c0_i32_0 = arith.constant 0 : i32
    return %c0_i32 : i32
  }
  func.func @transform_1(%arg0: i32) -> (i32, i32) {
    %c0_i32 = arith.constant 0 : i32
    %c0_i32_0 = arith.constant 0 : i32
    return %arg0, %c0_i32 : i32, i32
  }
  func.func @transform_2(%arg0: i32) -> (i32, i32) {
    %c0_i32 = arith.constant 0 : i32
    %c0_i32_0 = arith.constant 0 : i32
    return %arg0, %c0_i32 : i32, i32
  }
}

</mosaic_0001>

<bundles_post_ra>
// kernel: tpu_custom_call.1
= control target key start
LH: loop header
LB: loop body
LE: loop exit
PB: predicated region body
PF: predicated region fallthrough
CT: control target
= control target key end

     0   :  { %7 = vsyncpa [#allocation5], 0  ;;  %s239_s0 = inlined_call_operand.hbm [shape: f32[4], index: 0, kind: input, shape index: {}]   ;;  %s240_s1 = inlined_call_operand.hbm [shape: f32[16,128], index: 1, kind: input, shape index: {}]   ;;  %s241_s2 = inlined_call_operand.hbm [shape: f32[16,128], index: 2, kind: output, shape index: {}]  }
   0x1   :  { %8 = vsyncpa [#allocation3], 0 }
   0x2   :  { %9 = vsyncpa [#allocation4], 0  ;;  %s117_s11 = scalar_lea.hbm %s239_s0, 16 }
   0x3   :  { %p118_p0 = scmp.ne.s32.totalorder %s239_s0, %s117_s11  ;;  %p121_p1 = scmp.lt.u32.totalorder %s117_s11, %s239_s0 }
   0x5   :  { %p123_p2 = pnand %p121_p1, %p118_p0 }
   0x7   :  { %126 = shalt.err (!%p123_p2)
}
   0x8   :  { %s177_s16 = smov [#allocation2]   ;;  %s178_s19 = smov [#allocation6]  }
   0x9   :  { %17 = dma.hbm_to_smem %s239_s0, 16, %s177_s16, [#allocation5]  }
   0xa   :  { %s23_s20 = sshll.u32 %s178_s19, 4  ;;  %s127_s23 = scalar_lea.hbm %s240_s1, 256  ;;  %s24_s20 = int_to_ptr.vmem [resolvable:$true] %s23_s20 }
   0xb   :  { %p128_p3 = scmp.ne.s32.totalorder %s240_s1, %s127_s23  ;;  %p131_p4 = scmp.lt.u32.totalorder %s127_s23, %s240_s1 }
   0xd   :  { %p133_p5 = pnand %p131_p4, %p128_p3 }
   0xf   :  { %136 = shalt.err (!%p133_p5)
}
  0x10   :  { %s137_s28 = scalar_lea.vmem %s24_s20, 256  ;;  %p142_p7 = scmp.lt.s32.totalorder %s24_s20, %s24_s20 }
  0x11   :  { %p138_p6 = scmp.ne.s32.totalorder %s24_s20, %s137_s28  ;;  %p143_p8 = scmp.lt.s32.totalorder %s137_s28, %s137_s28 }
  0x13   :  { %p144_p9 = por %p143_p8, %p142_p7 }
  0x15   :  { %p145_p10 = pnand %p144_p9, %p138_p6 }
  0x17   :  { %148 = shalt.err (!%p145_p10)
}
  0x18   :  { %s179_s0 = smov 128   ;;  %s180_s29 = smov 8  }
  0x19   :  { %29 = dma.hbm_to_vmem [thread:$0]  %s240_s1, 256, %s24_s20, [#allocation3], %s179_s0, %s179_s0, %s180_s29  }
  0x1a   :  { %171 = dma.done.wait [#allocation5], 16  }
  0x1b   :  { %172 = vsyncadd [#allocation5], 4294967280 }
  0x1c   :  { %173 = dma.done.wait [#allocation3], 256  }
  0x1d   :  { %174 = vsyncadd [#allocation3], 4294967040 }
  0x1e   :  { %36 = sfence }
  0x1f   :  { %s37_s4 = sld [smem:[#allocation2]]  ;;  %s103_s5 = sld [smem:[#allocation2 + $0x3]]  ;;  %v41_v0 = vld [vmem:[#allocation6] sm:$0xff]  ;;  %v42_v1 = vld [vmem:[#allocation6 + $0x8] sm:$0xff] }
  0x20   :  { %s101_s1 = sld [smem:[#allocation2 + $0x1]]  ;;  %s102_s6 = sld [smem:[#allocation2 + $0x2]] }
  0x21   :  { %s181_s7 = smov [#allocation7]  }
  0x22   :  { %s88_s8 = sshll.u32 %s181_s7, 4  ;;  %s89_s8 = int_to_ptr.vmem [resolvable:$true] %s88_s8 }
  0x23   :  { %s149_s9 = scalar_lea.vmem %s89_s8, 256  ;;  %p154_p12 = scmp.lt.s32.totalorder %s89_s8, %s89_s8 }
  0x24   :  { %p150_p11 = scmp.ne.s32.totalorder %s89_s8, %s149_s9  ;;  %p155_p13 = scmp.lt.s32.totalorder %s149_s9, %s149_s9 }
  0x25   :  { %v43_v2 = vstv %s37_s4  ;;  %v46_v4 = vstv %s103_s5 }
  0x26   :  { %v44_v3 = vmul.f32 %v43_v2, %v41_v0  ;;  %v45_v5 = vmul.f32 %v43_v2, %v42_v1  ;;  %v75_v25 = vstv %s101_s1  ;;  %v78_v29 = vstv %s102_s6  ;;  %p156_p0 = por %p155_p13, %p154_p12 }
  0x28   :  { %v47_v6 = vmin.f32 %v44_v3, %v46_v4  ;;  %v48_v7 = vmin.f32 %v45_v5, %v46_v4  ;;  %vm49_vm1 = vcmp.gt.f32.partialorder %v44_v3, %v46_v4  ;;  %vm50_vm3 = vcmp.gt.f32.partialorder %v45_v5, %v46_v4  ;;  %p157_p1 = pnand %p156_p0, %p150_p11 }
  0x2a   :  { %v51_v8 = vmul.f32 1.442695, %v47_v6  ;;  %v53_v9 = vmul.f32 1.442695, %v48_v7 }
  0x2c   :  { %109 = vpow2.f32 %v51_v8 }
  0x2d   :  { %111 = vpow2.f32 %v53_v9 }
  0x36   :  { %v110_v10 = vpop.eup %109 }
  0x37   :  { %v112_v11 = vpop.eup %111  ;;  %v55_v12 = vadd.f32 1.0, %v110_v10  ;;  %v58_v14 = vmul.f32 -0.5, %v110_v10  ;;  %v61_v17 = vand.u32 2147483647, %v110_v10 }
  0x38   :  { %v64_v13 = vadd.f32 1.0, %v112_v11  ;;  %v67_v15 = vmul.f32 -0.5, %v112_v11  ;;  %v70_v19 = vand.u32 2147483647, %v112_v11 }
  0x39   :  { %113 = vlog2.f32 %v55_v12  ;;  %v59_v16 = vadd.f32 1.0, %v58_v14  ;;  %vm62_vm0 = vcmp.lt.f32.partialorder %v61_v17, 0.0004427343 }
  0x3a   :  { %115 = vlog2.f32 %v64_v13  ;;  %v68_v18 = vadd.f32 1.0, %v67_v15  ;;  %vm71_vm2 = vcmp.lt.f32.partialorder %v70_v19, 0.0004427343 }
  0x3b   :  { %v60_v20 = vmul.f32 %v110_v10, %v59_v16 }
  0x3c   :  { %v69_v22 = vmul.f32 %v112_v11, %v68_v18 }
  0x43   :  { %v114_v21 = vpop.eup %113 }
  0x44   :  { %v116_v23 = vpop.eup %115  ;;  %v57_v24 = vmul.f32 0.6931472, %v114_v21 }
  0x45   :  { %v66_v26 = vmul.f32 0.6931472, %v116_v23 }
  0x46   :  { %v63_v27 = vsel %vm62_vm0, %v60_v20, %v57_v24 }
  0x47   :  { %v73_v28 = vsel %vm49_vm1, %v44_v3, %v63_v27  ;;  %v72_v30 = vsel %vm71_vm2, %v69_v22, %v66_v26 }
  0x48   :  { %v76_v31 = vmul.f32 %v75_v25, %v73_v28  ;;  %v74_v32 = vsel %vm50_vm3, %v45_v5, %v72_v30 }
  0x49   :  { %v77_v33 = vmul.f32 %v75_v25, %v74_v32 }
  0x4a   :  { %v79_v34 = vsub.f32 %v76_v31, %v78_v29 }
  0x4b   :  { %v80_v35 = vsub.f32 %v77_v33, %v78_v29 }
  0x4c   :  { %81 = vst [vmem:[#allocation7] sm:$0xff] %v79_v34 }
  0x4d   :  { %82 = vst [vmem:[#allocation7 + $0x8] sm:$0xff] %v80_v35 }
  0x4e   :  { %160 = shalt.err (!%p157_p1)
}
  0x4f   :  { %s161_s12 = scalar_lea.hbm %s241_s2, 256 }
  0x50   :  { %p162_p2 = scmp.ne.s32.totalorder %s241_s2, %s161_s12  ;;  %p165_p3 = scmp.lt.u32.totalorder %s161_s12, %s241_s2 }
  0x52   :  { %p167_p4 = pnand %p165_p3, %p162_p2 }
  0x54   :  { %170 = shalt.err (!%p167_p4)
}
  0x55   :  { %94 = dma.vmem_to_hbm [thread:$0]  %s89_s8, 256, %s241_s2, [#allocation4], %s179_s0, %s179_s0, %s180_s29  }
  0x56   :  { %175 = dma.done.wait [#allocation4], 256  }
  0x57   :  { %176 = vsyncadd [#allocation4], 4294967040 }
  0x58   :  { %98 = vsyncpa [#allocation3], 1 }
  0x59   :  { %99 = vsyncpa [#allocation4], 1 }
  0x5a   :  { %100 = vsyncpa [#allocation5], 1 }

</bundles_post_ra>
